<compile_context>
chip_gen: v7x
topology: tpu7x:2x2x1
jax: 0.10.0
libtpu: 0.0.40
codegen_flags: <defaults>
</compile_context>

<pallas_src>
import functools

import jax
import jax.numpy as jnp
from jax.experimental import pallas as pl
from jax.experimental.pallas import tpu as pltpu


def _round_up(x, m):
    return ((x + m - 1) // m) * m


def _fused_head_kernel(w_ref,            # SMEM (1, 1) scalar mixing weight
                       g_ref, t_ref,     # VMEM (tile_n, F) gnn / tabular tiles (f32)
                       w1_ref, b1_ref,   # (F, F) matmul_dtype, (1, F) f32
                       w2_ref, b2_ref,   # (F, F) matmul_dtype, (1, F) f32
                       w3_ref, b3_ref,   # (F, OUT_PAD) matmul_dtype, (1, OUT_PAD) f32
                       o_ref,            # VMEM (tile_n, OUT_PAD)
                       *, matmul_dtype):
    w = w_ref[0, 0]
    g = g_ref[...]
    t = t_ref[...]
    # x = w*g + (1-w)*t  ==  t + w*(g - t)   (f32 on the VPU, one fewer vmul)
    x = t + w * (g - t)

    # f1 -> (dropout = identity) -> relu   (MXU matmul, f32 accumulation)
    h = jnp.dot(x.astype(matmul_dtype), w1_ref[...],
                preferred_element_type=jnp.float32) + b1_ref[...]
    h = jnp.maximum(h, 0.0)

    # f2 -> relu
    h = jnp.dot(h.astype(matmul_dtype), w2_ref[...],
                preferred_element_type=jnp.float32) + b2_ref[...]
    h = jnp.maximum(h, 0.0)

    # f3 (output padded to 128 lanes -> unmasked full-lane store)
    o_ref[...] = (jnp.dot(h.astype(matmul_dtype), w3_ref[...],
                          preferred_element_type=jnp.float32)
                  + b3_ref[...]).astype(o_ref.dtype)


def feature_jiaquan_forward(gnn_x, tabular_x, params, *,
                            tile_n=2048,
                            matmul_dtype=jnp.bfloat16,
                            out_dtype=jnp.float32):
    """Fused head of feature_jiaquan. gnn_x, tabular_x: [N, F] -> [N, 2] float32."""
    N, F = gnn_x.shape
    OUT = 2
    OUT_PAD = 128  # lane-dense output slab (sliced back to 2 outside the kernel)

    # ---- inputs stay unpadded; only tiny weights are padded / cast host-side ----
    g = jnp.asarray(gnn_x, jnp.float32)
    t = jnp.asarray(tabular_x, jnp.float32)

    w_bytes = jnp.dtype(matmul_dtype).itemsize
    out_bytes = jnp.dtype(out_dtype).itemsize

    W1 = jnp.asarray(params["W1"], matmul_dtype)                       # (F, F)
    W2 = jnp.asarray(params["W2"], matmul_dtype)                       # (F, F)
    W3 = jnp.pad(jnp.asarray(params["W3"], jnp.float32),
                 ((0, 0), (0, OUT_PAD - OUT))).astype(matmul_dtype)    # (F, 128)
    b1 = jnp.asarray(params["b1"], jnp.float32).reshape(1, F)
    b2 = jnp.asarray(params["b2"], jnp.float32).reshape(1, F)
    b3 = jnp.pad(jnp.asarray(params["b3"], jnp.float32).reshape(1, OUT),
                 ((0, 0), (0, OUT_PAD - OUT)))                         # (1, 128)
    w_scalar = jnp.asarray(params["weight"], jnp.float32).reshape(1, 1)

    # ---- generation-aware VMEM budget (v7x: 64 MiB, v5e/v6e: 128 MiB) ----
    try:
        vmem_cap = int(pltpu.get_tpu_info().vmem_capacity_bytes)
    except Exception:  # fall back to the smallest (v7x) part
        vmem_cap = 64 << 20
    VMEM_BUDGET = int(vmem_cap * 3 // 4)                   # 48 MiB v7x / 96 MiB v6e
    VMEM_LIMIT_CAP = min(int(vmem_cap * 7 // 8), vmem_cap - (8 << 20))

    def _vmem_estimate(tn):
        act = 2 * 2 * tn * F * 4                 # double-buffered gnn/tabular tiles (f32)
        outb = 2 * tn * OUT_PAD * out_bytes      # double-buffered output tile
        wgts = 2 * (2 * F * F + F * OUT_PAD) * w_bytes   # weights (counted 2 bufs each)
        bias = 2 * (2 * F + OUT_PAD) * 4
        interm = 2 * tn * max(F, OUT_PAD) * 4 + tn * F * w_bytes  # f32 h + bf16 casts
        return act + outb + wgts + bias + interm

    if _vmem_estimate(8) > VMEM_BUDGET:
        # TODO(synk): add a K-tiled (reduction grid axis over F with a VMEM f32
        # accumulator, "arbitrary" semantics) variant for very large f1 instead
        # of failing; not needed for this module's typical sizes.
        raise ValueError(
            f"f1={F} too large for VMEM-resident weights: "
            f"{_vmem_estimate(8)} B > {VMEM_BUDGET} B budget")

    # ---- row-tile sizing: multiple of 8, fits the budget, >= 2 grid steps ----
    tile_n = max(8, min(_round_up(tile_n, 8), _round_up(N, 8)))
    while _vmem_estimate(tile_n) > VMEM_BUDGET and tile_n > 8:
        tile_n = max(8, _round_up(tile_n // 2, 8))
    # v7x has 2 TensorCores; make sure the "parallel" row axis has >= 2 steps so
    # the grid can shard across both (cheap no-op on single-TC v5e/v6e).
    while pl.cdiv(N, tile_n) < 2 and tile_n > 8:
        tile_n = max(8, _round_up(tile_n // 2, 8))

    grid = (pl.cdiv(N, tile_n),)  # ragged last block handled by Pallas (masked store)

    # ---- specs: row tiles for activations/output, VMEM-resident weights ----
    row_spec = pl.BlockSpec((tile_n, F), lambda i: (i, 0))
    resident = lambda shape: pl.BlockSpec(shape, lambda i: (0, 0))

    vmem_limit = int(min(max(2 * _vmem_estimate(tile_n), 32 << 20), VMEM_LIMIT_CAP))

    flops = 2 * N * F * (2 * F + OUT_PAD)
    bytes_accessed = (2 * N * F * 4
                      + (2 * F * F + F * OUT_PAD) * w_bytes
                      + (2 * F + OUT_PAD) * 4
                      + N * OUT_PAD * out_bytes)

    out_padded = pl.pallas_call(
        functools.partial(_fused_head_kernel, matmul_dtype=matmul_dtype),
        out_shape=jax.ShapeDtypeStruct((N, OUT_PAD), out_dtype),
        grid=grid,
        in_specs=[
            pl.BlockSpec((1, 1), lambda i: (0, 0),
                         memory_space=pltpu.MemorySpace.SMEM),  # mixing weight
            row_spec, row_spec,                                  # gnn_x, tabular_x
            resident((F, F)), resident((1, F)),                  # W1, b1
            resident((F, F)), resident((1, F)),                  # W2, b2
            resident((F, OUT_PAD)), resident((1, OUT_PAD)),      # W3, b3
        ],
        out_specs=pl.BlockSpec((tile_n, OUT_PAD), lambda i: (i, 0)),
        compiler_params=pltpu.CompilerParams(
            dimension_semantics=("parallel",),
            vmem_limit_bytes=vmem_limit),
        cost_estimate=pl.CostEstimate(
            flops=flops, transcendentals=0, bytes_accessed=bytes_accessed),
    )(w_scalar, g, t, W1, b1, W2, b2, W3, b3)

    # strip the lane padding of the 2-logit output
    return out_padded[:, :OUT].astype(jnp.float32)


def init_params(key, f1):
    """Deterministic synthetic parameter init (shapes match the nn.Module)."""
    ks = jax.random.split(key, 7)
    scale1 = 1.0 / jnp.sqrt(f1)
    return {
        # nn.Parameter(torch.randn(1))
        "weight": jax.random.normal(ks[0], (1,), jnp.float32),
        # nn.Linear(f1, f1) stored [in, out]
        "W1": jax.random.uniform(ks[1], (f1, f1), jnp.float32, -scale1, scale1),
        "b1": jax.random.uniform(ks[2], (1, f1), jnp.float32, -scale1, scale1),
        # nn.Linear(f1, f1)
        "W2": jax.random.uniform(ks[3], (f1, f1), jnp.float32, -scale1, scale1),
        "b2": jax.random.uniform(ks[4], (1, f1), jnp.float32, -scale1, scale1),
        # nn.Linear(f1, 2)
        "W3": jax.random.uniform(ks[5], (f1, 2), jnp.float32, -scale1, scale1),
        "b3": jax.random.uniform(ks[6], (1, 2), jnp.float32, -scale1, scale1),
    }


def reference_forward(gnn_x, tabular_x, params):
    """Plain-JAX reference for correctness checking."""
    w = params["weight"][0]
    x = w * gnn_x + (1.0 - w) * tabular_x
    x = jnp.maximum(x @ params["W1"] + params["b1"], 0.0)
    x = jnp.maximum(x @ params["W2"] + params["b2"], 0.0)
    return x @ params["W3"] + params["b3"]


if __name__ == "__main__":
    N, F1 = 8, 32  # small shapes: 8 rows, f1 = 32

    key = jax.random.PRNGKey(0)
    k_params, k_gnn, k_tab = jax.random.split(key, 3)

    params = init_params(k_params, F1)
    # Stand-ins for gnnmodel(data) and CrossModel(data.tb) outputs, both [N, f1].
    gnn_x = jax.random.normal(k_gnn, (N, F1), jnp.float32)
    tabular_x = jax.random.normal(k_tab, (N, F1), jnp.float32)

    ref = reference_forward(gnn_x, tabular_x, params)

    # exact-precision path (f32 MXU operands) -> tight check
    out_f32 = jax.block_until_ready(
        feature_jiaquan_forward(gnn_x, tabular_x, params,
                                matmul_dtype=jnp.float32))
    assert out_f32.shape == (N, 2), out_f32.shape
    assert jnp.allclose(out_f32, ref, atol=1e-5, rtol=1e-5), \
        f"f32 max abs diff {jnp.max(jnp.abs(out_f32 - ref))}"

    # default fast path (bf16 MXU operands, f32 accumulation) -> loose check
    out_bf16 = jax.block_until_ready(
        feature_jiaquan_forward(gnn_x, tabular_x, params))
    assert out_bf16.shape == (N, 2), out_bf16.shape
    assert jnp.allclose(out_bf16, ref, atol=1e-1, rtol=1e-1), \
        f"bf16 max abs diff {jnp.max(jnp.abs(out_bf16 - ref))}"

    print("KERNEL_OK")
</pallas_src>

<mosaic_0001>
module attributes {stable_mosaic.version = 11 : i64} {
  func.func @_fused_head_kernel(%arg0: i32, %arg1: memref<1x1xf32, #tpu.memory_space<smem>>, %arg2: memref<8x32xf32, #tpu.memory_space<vmem>>, %arg3: memref<8x32xf32, #tpu.memory_space<vmem>>, %arg4: memref<32x32xf32, #tpu.memory_space<vmem>>, %arg5: memref<1x32xf32, #tpu.memory_space<vmem>>, %arg6: memref<32x32xf32, #tpu.memory_space<vmem>>, %arg7: memref<1x32xf32, #tpu.memory_space<vmem>>, %arg8: memref<32x128xf32, #tpu.memory_space<vmem>>, %arg9: memref<1x128xf32, #tpu.memory_space<vmem>>, %arg10: memref<8x128xf32, #tpu.memory_space<vmem>>) attributes {dimension_semantics = [#tpu.dimension_semantics<parallel>], iteration_bounds = array<i64: 1>, scalar_prefetch = 0 : i64, scratch_operands = 0 : i64, tpu.core_type = #tpu.core_type<tc>, window_params = [{transform_indices = @transform_0, window_bounds = array<i64: 1, 1>}, {transform_indices = @transform_1, window_bounds = array<i64: 8, 32>}, {transform_indices = @transform_2, window_bounds = array<i64: 8, 32>}, {pipeline_mode = #tpu.pipeline_mode<synchronous>, transform_indices = @transform_3, window_bounds = array<i64: 32, 32>}, {pipeline_mode = #tpu.pipeline_mode<synchronous>, transform_indices = @transform_4, window_bounds = array<i64: 1, 32>}, {pipeline_mode = #tpu.pipeline_mode<synchronous>, transform_indices = @transform_5, window_bounds = array<i64: 32, 32>}, {pipeline_mode = #tpu.pipeline_mode<synchronous>, transform_indices = @transform_6, window_bounds = array<i64: 1, 32>}, {pipeline_mode = #tpu.pipeline_mode<synchronous>, transform_indices = @transform_7, window_bounds = array<i64: 32, 128>}, {pipeline_mode = #tpu.pipeline_mode<synchronous>, transform_indices = @transform_8, window_bounds = array<i64: 1, 128>}, {transform_indices = @transform_9, window_bounds = array<i64: 8, 128>}]} {
    %c0 = arith.constant 0 : index
    %c0_0 = arith.constant 0 : index
    %0 = memref.load %arg1[%c0, %c0_0] : memref<1x1xf32, #tpu.memory_space<smem>>
    %c0_1 = arith.constant 0 : index
    %c0_2 = arith.constant 0 : index
    %1 = vector.load %arg2[%c0_1, %c0_2] : memref<8x32xf32, #tpu.memory_space<vmem>>, vector<8x32xf32>
    %c0_3 = arith.constant 0 : index
    %c0_4 = arith.constant 0 : index
    %2 = vector.load %arg3[%c0_3, %c0_4] : memref<8x32xf32, #tpu.memory_space<vmem>>, vector<8x32xf32>
    %3 = arith.subf %1, %2 : vector<8x32xf32>
    %4 = vector.broadcast %0 : f32 to vector<8x32xf32>
    %5 = arith.mulf %4, %3 : vector<8x32xf32>
    %6 = arith.addf %2, %5 : vector<8x32xf32>
    %c0_5 = arith.constant 0 : index
    %c0_6 = arith.constant 0 : index
    %7 = vector.load %arg4[%c0_5, %c0_6] : memref<32x32xf32, #tpu.memory_space<vmem>>, vector<32x32xf32>
    %cst = arith.constant dense<0.000000e+00> : vector<8x32xf32>
    %8 = tpu.matmul %6, %7, %cst {dimension_numbers = #tpu.dot_dimension_numbers<[1], [0], [0], [1], [0, 0, 1, 1], [], []>} : vector<8x32xf32>, vector<32x32xf32>, vector<8x32xf32> -> vector<8x32xf32>
    %c0_7 = arith.constant 0 : index
    %c0_8 = arith.constant 0 : index
    %9 = vector.load %arg5[%c0_7, %c0_8] : memref<1x32xf32, #tpu.memory_space<vmem>>, vector<1x32xf32>
    %10 = vector.broadcast %9 : vector<1x32xf32> to vector<8x32xf32>
    %11 = arith.addf %8, %10 : vector<8x32xf32>
    %cst_9 = arith.constant 0.000000e+00 : f32
    %12 = vector.broadcast %cst_9 : f32 to vector<8x32xf32>
    %13 = arith.maximumf %11, %12 : vector<8x32xf32>
    %c0_10 = arith.constant 0 : index
    %c0_11 = arith.constant 0 : index
    %14 = vector.load %arg6[%c0_10, %c0_11] : memref<32x32xf32, #tpu.memory_space<vmem>>, vector<32x32xf32>
    %cst_12 = arith.constant dense<0.000000e+00> : vector<8x32xf32>
    %15 = tpu.matmul %13, %14, %cst_12 {dimension_numbers = #tpu.dot_dimension_numbers<[1], [0], [0], [1], [0, 0, 1, 1], [], []>} : vector<8x32xf32>, vector<32x32xf32>, vector<8x32xf32> -> vector<8x32xf32>
    %c0_13 = arith.constant 0 : index
    %c0_14 = arith.constant 0 : index
    %16 = vector.load %arg7[%c0_13, %c0_14] : memref<1x32xf32, #tpu.memory_space<vmem>>, vector<1x32xf32>
    %17 = vector.broadcast %16 : vector<1x32xf32> to vector<8x32xf32>
    %18 = arith.addf %15, %17 : vector<8x32xf32>
    %cst_15 = arith.constant 0.000000e+00 : f32
    %19 = vector.broadcast %cst_15 : f32 to vector<8x32xf32>
    %20 = arith.maximumf %18, %19 : vector<8x32xf32>
    %c0_16 = arith.constant 0 : index
    %c0_17 = arith.constant 0 : index
    %21 = vector.load %arg8[%c0_16, %c0_17] : memref<32x128xf32, #tpu.memory_space<vmem>>, vector<32x128xf32>
    %cst_18 = arith.constant dense<0.000000e+00> : vector<8x128xf32>
    %22 = tpu.matmul %20, %21, %cst_18 {dimension_numbers = #tpu.dot_dimension_numbers<[1], [0], [0], [1], [0, 0, 1, 1], [], []>} : vector<8x32xf32>, vector<32x128xf32>, vector<8x128xf32> -> vector<8x128xf32>
    %c0_19 = arith.constant 0 : index
    %c0_20 = arith.constant 0 : index
    %23 = vector.load %arg9[%c0_19, %c0_20] : memref<1x128xf32, #tpu.memory_space<vmem>>, vector<1x128xf32>
    %24 = vector.broadcast %23 : vector<1x128xf32> to vector<8x128xf32>
    %25 = arith.addf %22, %24 : vector<8x128xf32>
    %c0_21 = arith.constant 0 : index
    %c0_22 = arith.constant 0 : index
    %26 = vector.load %arg10[%c0_21, %c0_22] : memref<8x128xf32, #tpu.memory_space<vmem>>, vector<8x128xf32>
    tpu.vector_store %arg10[%c0_21, %c0_22], %25 {strides = array<i32>} : memref<8x128xf32, #tpu.memory_space<vmem>>, vector<8x128xf32>,
    return
  }
  func.func @transform_0(%arg0: i32) -> (i32, i32) {
    %c0_i32 = arith.constant 0 : i32
    %c0_i32_0 = arith.constant 0 : i32
    %c0_i32_1 = arith.constant 0 : i32
    return %c0_i32, %c0_i32_0 : i32, i32
  }
  func.func @transform_1(%arg0: i32) -> (i32, i32) {
    %c0_i32 = arith.constant 0 : i32
    %c0_i32_0 = arith.constant 0 : i32
    return %arg0, %c0_i32 : i32, i32
  }
  func.func @transform_2(%arg0: i32) -> (i32, i32) {
    %c0_i32 = arith.constant 0 : i32
    %c0_i32_0 = arith.constant 0 : i32
    return %arg0, %c0_i32 : i32, i32
  }
  func.func @transform_3(%arg0: i32) -> (i32, i32) {
    %c0_i32 = arith.constant 0 : i32
    %c0_i32_0 = arith.constant 0 : i32
    %c0_i32_1 = arith.constant 0 : i32
    return %c0_i32, %c0_i32_0 : i32, i32
  }
  func.func @transform_4(%arg0: i32) -> (i32, i32) {
    %c0_i32 = arith.constant 0 : i32
    %c0_i32_0 = arith.constant 0 : i32
    %c0_i32_1 = arith.constant 0 : i32
    return %c0_i32, %c0_i32_0 : i32, i32
  }
  func.func @transform_5(%arg0: i32) -> (i32, i32) {
    %c0_i32 = arith.constant 0 : i32
    %c0_i32_0 = arith.constant 0 : i32
    %c0_i32_1 = arith.constant 0 : i32
    return %c0_i32, %c0_i32_0 : i32, i32
  }
  func.func @transform_6(%arg0: i32) -> (i32, i32) {
    %c0_i32 = arith.constant 0 : i32
    %c0_i32_0 = arith.constant 0 : i32
    %c0_i32_1 = arith.constant 0 : i32
    return %c0_i32, %c0_i32_0 : i32, i32
  }
  func.func @transform_7(%arg0: i32) -> (i32, i32) {
    %c0_i32 = arith.constant 0 : i32
    %c0_i32_0 = arith.constant 0 : i32
    %c0_i32_1 = arith.constant 0 : i32
    return %c0_i32, %c0_i32_0 : i32, i32
  }
  func.func @transform_8(%arg0: i32) -> (i32, i32) {
    %c0_i32 = arith.constant 0 : i32
    %c0_i32_0 = arith.constant 0 : i32
    %c0_i32_1 = arith.constant 0 : i32
    return %c0_i32, %c0_i32_0 : i32, i32
  }
  func.func @transform_9(%arg0: i32) -> (i32, i32) {
    %c0_i32 = arith.constant 0 : i32
    %c0_i32_0 = arith.constant 0 : i32
    return %arg0, %c0_i32 : i32, i32
  }
}

</mosaic_0001>

<bundles_post_ra>
// kernel: tpu_custom_call.1
= control target key start
LH: loop header
LB: loop body
LE: loop exit
PB: predicated region body
PF: predicated region fallthrough
CT: control target
= control target key end

     0   :  { %15 = vsyncpa [#allocation4], 0  ;;  %s761_s0 = inlined_call_operand.<no memory space> [shape: f32[1,1], index: 0, kind: input, shape index: {}]   ;;  %s762_s1 = inlined_call_operand.hbm [shape: f32[8,32], index: 1, kind: input, shape index: {}]   ;;  %s763_s2 = inlined_call_operand.hbm [shape: f32[8,32], index: 2, kind: input, shape index: {}]   ;;  %s764_s3 = inlined_call_operand.hbm [shape: f32[32,32], index: 3, kind: input, shape index: {}]   ;;  %s765_s4 = inlined_call_operand.vmem [shape: f32[1,32], index: 4, kind: input, shape index: {}]   ;;  %s766_s5 = inlined_call_operand.hbm [shape: f32[32,32], index: 5, kind: input, shape index: {}]   ;;  %s767_s6 = inlined_call_operand.vmem [shape: f32[1,32], index: 6, kind: input, shape index: {}]   ;;  %s768_s7 = inlined_call_operand.hbm [shape: f32[32,128], index: 7, kind: input, shape index: {}]   ;;  %s769_s8 = inlined_call_operand.vmem [shape: f32[1,128], index: 8, kind: input, shape index: {}]   ;;  %s770_s9 = inlined_call_operand.hbm [shape: f32[8,128], index: 9, kind: output, shape index: {}]  }
   0x1   :  { %16 = vsyncpa [#allocation7], 0 }
   0x2   :  { %17 = vsyncpa [#allocation10], 0 }
   0x3   :  { %18 = vsyncpa [#allocation5], 0  ;;  %s601_s30 = smov [#allocation6]   ;;  %s461_s13 = scalar_lea.hbm %s763_s2, 128 }
   0x4   :  { %s37_s10 = sshll.u32 %s601_s30, 4  ;;  %p462_p0 = scmp.ne.s32.totalorder %s763_s2, %s461_s13  ;;  %s38_s10 = int_to_ptr.vmem [resolvable:$true] %s37_s10 }
   0x5   :  { %p465_p1 = scmp.lt.u32.totalorder %s461_s13, %s763_s2 }
   0x7   :  { %p467_p2 = pnand %p465_p1, %p462_p0 }
   0x9   :  { %470 = shalt.err (!%p467_p2)
}
   0xa   :  { %s471_s18 = scalar_lea.vmem %s38_s10, 128  ;;  %p476_p4 = scmp.lt.s32.totalorder %s38_s10, %s38_s10 }
   0xb   :  { %p472_p3 = scmp.ne.s32.totalorder %s38_s10, %s471_s18  ;;  %p477_p5 = scmp.lt.s32.totalorder %s471_s18, %s471_s18 }
   0xd   :  { %p478_p6 = por %p477_p5, %p476_p4 }
   0xf   :  { %p479_p7 = pnand %p478_p6, %p472_p3 }
  0x11   :  { %482 = shalt.err (!%p479_p7)
}
  0x12   :  { %40 = dma.hbm_to_vmem [thread:$0]  %s763_s2, 128, %s38_s10, [#allocation7]  }
  0x13   :  { %s602_s21 = smov [#allocation9]   ;;  %s603_s23 = smov [#allocation3]  }
  0x14   :  { %s60_s22 = sshll.u32 %s602_s21, 4  ;;  %s27_s24 = sshll.u32 %s603_s23, 4  ;;  %s61_s22 = int_to_ptr.vmem [resolvable:$true] %s60_s22  ;;  %s28_s24 = int_to_ptr.vmem [resolvable:$true] %s27_s24 }
  0x15   :  { %s483_s27 = scalar_lea.hbm %s766_s5, 512 }
  0x16   :  { %p484_p8 = scmp.ne.s32.totalorder %s766_s5, %s483_s27  ;;  %p487_p9 = scmp.lt.u32.totalorder %s483_s27, %s766_s5 }
  0x18   :  { %p489_p10 = pnand %p487_p9, %p484_p8 }
  0x1a   :  { %492 = shalt.err (!%p489_p10)
}
  0x1b   :  { %s493_s2 = scalar_lea.vmem %s61_s22, 512  ;;  %p498_p12 = scmp.lt.s32.totalorder %s61_s22, %s61_s22 }
  0x1c   :  { %p494_p11 = scmp.ne.s32.totalorder %s61_s22, %s493_s2  ;;  %p499_p13 = scmp.lt.s32.totalorder %s493_s2, %s493_s2 }
  0x1e   :  { %p500_p0 = por %p499_p13, %p498_p12 }
  0x20   :  { %p501_p1 = pnand %p500_p0, %p494_p11 }
  0x22   :  { %504 = shalt.err (!%p501_p1)
}
  0x23   :  { %s604_s10 = smov 128   ;;  %s605_s12 = smov 8  }
  0x24   :  { %66 = dma.hbm_to_vmem [thread:$0]  %s766_s5, 512, %s61_s22, [#allocation10], %s604_s10, %s604_s10, %s605_s12  }
  0x25   :  { %s505_s17 = scalar_lea.hbm %s762_s1, 128 }
  0x26   :  { %p506_p2 = scmp.ne.s32.totalorder %s762_s1, %s505_s17  ;;  %p509_p3 = scmp.lt.u32.totalorder %s505_s17, %s762_s1 }
  0x28   :  { %p511_p4 = pnand %p509_p3, %p506_p2 }
  0x2a   :  { %514 = shalt.err (!%p511_p4)
}
  0x2b   :  { %s515_s23 = scalar_lea.vmem %s28_s24, 128  ;;  %p520_p6 = scmp.lt.s32.totalorder %s28_s24, %s28_s24 }
  0x2c   :  { %p516_p5 = scmp.ne.s32.totalorder %s28_s24, %s515_s23  ;;  %p521_p7 = scmp.lt.s32.totalorder %s515_s23, %s515_s23 }
  0x2e   :  { %p522_p8 = por %p521_p7, %p520_p6 }
  0x30   :  { %p523_p9 = pnand %p522_p8, %p516_p5 }
  0x32   :  { %526 = shalt.err (!%p523_p9)
}
  0x33   :  { %30 = dma.hbm_to_vmem [thread:$0]  %s762_s1, 128, %s28_s24, [#allocation4]  }
  0x34   :  { %s606_s25 = smov [#allocation8]   ;;  %s607_s27 = smov [#allocation11]  }
  0x35   :  { %s46_s26 = sshll.u32 %s606_s25, 4  ;;  %s74_s28 = sshll.u32 %s607_s27, 4  ;;  %s47_s26 = int_to_ptr.vmem [resolvable:$true] %s46_s26  ;;  %s75_s28 = int_to_ptr.vmem [resolvable:$true] %s74_s28 }
  0x36   :  { %s527_s11 = scalar_lea.hbm %s764_s3, 512 }
  0x37   :  { %p528_p10 = scmp.ne.s32.totalorder %s764_s3, %s527_s11  ;;  %p531_p11 = scmp.lt.u32.totalorder %s527_s11, %s764_s3 }
  0x39   :  { %p533_p12 = pnand %p531_p11, %p528_p10 }
  0x3b   :  { %536 = shalt.err (!%p533_p12)
}
  0x3c   :  { %s537_s1 = scalar_lea.vmem %s47_s26, 512  ;;  %p542_p0 = scmp.lt.s32.totalorder %s47_s26, %s47_s26 }
  0x3d   :  { %p538_p13 = scmp.ne.s32.totalorder %s47_s26, %s537_s1  ;;  %p543_p1 = scmp.lt.s32.totalorder %s537_s1, %s537_s1 }
  0x3f   :  { %p544_p2 = por %p543_p1, %p542_p0 }
  0x41   :  { %p545_p3 = pnand %p544_p2, %p538_p13 }
  0x43   :  { %548 = shalt.err (!%p545_p3)
}
  0x44   :  { %52 = dma.hbm_to_vmem [thread:$0]  %s764_s3, 512, %s47_s26, [#allocation7], %s604_s10, %s604_s10, %s605_s12  }
  0x45   :  { %s549_s19 = scalar_lea.hbm %s768_s7, 512 }
  0x46   :  { %p550_p4 = scmp.ne.s32.totalorder %s768_s7, %s549_s19  ;;  %p553_p5 = scmp.lt.u32.totalorder %s549_s19, %s768_s7 }
  0x48   :  { %p555_p6 = pnand %p553_p5, %p550_p4 }
  0x4a   :  { %558 = shalt.err (!%p555_p6)
}
  0x4b   :  { %s559_s22 = scalar_lea.vmem %s75_s28, 512  ;;  %p564_p8 = scmp.lt.s32.totalorder %s75_s28, %s75_s28 }
  0x4c   :  { %p560_p7 = scmp.ne.s32.totalorder %s75_s28, %s559_s22  ;;  %p565_p9 = scmp.lt.s32.totalorder %s559_s22, %s559_s22 }
  0x4e   :  { %p566_p10 = por %p565_p9, %p564_p8 }
  0x50   :  { %p567_p11 = pnand %p566_p10, %p560_p7 }
  0x52   :  { %570 = shalt.err (!%p567_p11)
}
  0x53   :  { %80 = dma.hbm_to_vmem [thread:$0]  %s768_s7, 512, %s75_s28, [#allocation10], %s604_s10, %s604_s10, %s605_s12  }
  0x54   :  { %593 = dma.done.wait [#allocation4], 128  }
  0x55   :  { %594 = vsyncadd [#allocation4], 4294967168 }
  0x56   :  { %595 = dma.done.wait [#allocation7], 640  }
  0x57   :  { %596 = vsyncadd [#allocation7], 4294966656 }
  0x58   :  { %597 = dma.done.wait [#allocation10], 1024  }
  0x59   :  { %598 = vsyncadd [#allocation10], 4294966272  ;;  %v608_v0 = vmov 0.0|0.0   ;;  %vm609_vm0 = vmmov 0   ;;  %v610_v1 = vmov 0.0   ;;  %v105_v2 = vld [vmem:[#allocation8] sm:$0xff]  ;;  %v102_v9 = vstv %s761_s0 }
  0x5a   :  { %432 = vmatprep.subr.bf16.mxu0 %v608_v0  ;;  %407 = vmatprep.mubr.msk.f32.mxu0 %vm609_vm0, %v610_v1  ;;  %v106_v3 = vld [vmem:[#allocation8 + $0x8] sm:$0xff]  ;;  %v107_v4 = vld [vmem:[#allocation8 + $0x10] sm:$0xff]  ;;  %v108_v6 = vld [vmem:[#allocation8 + $0x18] sm:$0xff]  ;;  %vm116_vm1 = vcmask 261120   ;;  %s611_s29 = smov [#allocation12]  }
  0x5b   :  { %438 = vmatprep.subr.bf16.mxu1 %v608_v0  ;;  %418 = vmatprep.mubr.msk.f32.mxu1 %vm609_vm0, %v610_v1  ;;  %v433_v5 = vpack.c.bf16 %v106_v3, %v105_v2  ;;  %v99_v7 = vld [vmem:[#allocation3] sm:$0xff]  ;;  %v100_v8 = vld [vmem:[#allocation6] sm:$0xff]  ;;  %v191_v11 = vld [vmem:[#allocation9] sm:$0xff]  ;;  %v436_v13 = vpack.c.bf16 %v108_v6, %v107_v4  ;;  %s367_s30 = sshll.u32 %s611_s29, 4  ;;  %s368_s30 = int_to_ptr.vmem [resolvable:$true] %s367_s30 }
  0x5c   :  { %v101_v10 = vsub.f32 %v99_v7, %v100_v8  ;;  %v192_v12 = vld [vmem:[#allocation9 + $0x8] sm:$0xff]  ;;  %v193_v17 = vld [vmem:[#allocation9 + $0x10] sm:$0xff]  ;;  %v194_v18 = vld [vmem:[#allocation9 + $0x18] sm:$0xff]  ;;  %s571_s11 = scalar_lea.vmem %s368_s30, 128  ;;  %p576_p13 = scmp.lt.s32.totalorder %s368_s30, %s368_s30 }
  0x5d   :  { %434 = vmatpush3.bf16.msra.mxu0 %v433_v5  ;;  %v439_v14 = vpack.c.bf16 %v192_v12, %v191_v11  ;;  %v442_v19 = vpack.c.bf16 %v194_v18, %v193_v17  ;;  %v276_v20 = vld [vmem:[#allocation11] sm:$0xff]  ;;  %v277_v21 = vld [vmem:[#allocation11 + $0x8] sm:$0xff]  ;;  %v378_v23 = vld [vmem:[%s765_s4] ss:$0 sm:$0xff]  ;;  %p572_p12 = scmp.ne.s32.totalorder %s368_s30, %s571_s11  ;;  %p577_p0 = scmp.lt.s32.totalorder %s571_s11, %s571_s11 }
  0x5e   :  { %435 = vmatprep.subr.bf16.mxu0 %v608_v0  ;;  %v103_v15 = vmul.f32 %v102_v9, %v101_v10  ;;  %v445_v22 = vpack.c.bf16 %v277_v21, %v276_v20  ;;  %v278_v28 = vld [vmem:[#allocation11 + $0x10] sm:$0xff]  ;;  %v279_v29 = vld [vmem:[#allocation11 + $0x18] sm:$0xff] }
  0x5f   :  { %440 = vmatpush3.bf16.msra.mxu1 %v439_v14  ;;  %v448_v30 = vpack.c.bf16 %v279_v29, %v278_v28  ;;  %v380_v31 = vld [vmem:[%s767_s6] ss:$0 sm:$0xff]  ;;  %p578_p1 = por %p577_p0, %p576_p13 }
  0x60   :  { %v104_v16 = vadd.f32 %v103_v15, %v100_v8  ;;  %441 = vmatprep.subr.bf16.mxu1 %v608_v0  ;;  %v382_v36 = vld [vmem:[%s769_s8] ss:$0 sm:$0xff] }
  0x61   :  { %437 = vmatpush3.bf16.msra.mxu0 %v436_v13  ;;  %p579_p2 = pnand %p578_p1, %p572_p12 }
  0x62   :  { %444 = vmatprep.subr.bf16.mxu0 %v608_v0 }
  0x63   :  { %443 = vmatpush3.bf16.msra.mxu1 %v442_v19 }
  0x64   :  { %408 = vmatmul.mubr.msk.f32.vlgmr.msra.gmra.mrb[0].mxu0 %vm116_vm1, %v104_v16 }
  0x65   :  { %429 = vmatprep.mubr.msk.f32.mxu0 %vm609_vm0, %v610_v1  ;;  %446 = vmatpush3.bf16.msra.mxu0 %v445_v22 }
  0x66   :  { %447 = vmatprep.subr.bf16.mxu0 %v608_v0 }
  0x69   :  { %449 = vmatpush3.bf16.msra.mxu0 %v448_v30 }
 0x137   :  { %v186_v24 = vpop.f32.mrb[0].mxu0 }
 0x138   :  { %v187_v25 = vadd.f32 %v378_v23, %v186_v24  ;;  %v409_v26 = vpop.f32.mrb[1].mxu0 }
 0x13a   :  { %v190_v27 = vmax.f32 %v187_v25, 0.0 }
 0x13c   :  { %419 = vmatmul.mubr.msk.f32.vlgmr.msra.gmra.mrb[0].mxu1 %vm116_vm1, %v190_v27 }
 0x20f   :  { %v271_v32 = vpop.f32.mrb[0].mxu1 }
 0x210   :  { %v272_v33 = vadd.f32 %v380_v31, %v271_v32  ;;  %v420_v34 = vpop.f32.mrb[1].mxu1 }
 0x212   :  { %v275_v35 = vmax.f32 %v272_v33, 0.0 }
 0x214   :  { %430 = vmatmul.mubr.msk.f32.vlgmr.msra.gmra.mrb[2].mxu0 %vm116_vm1, %v275_v35 }
 0x2e7   :  { %v356_v37 = vpop.f32.mrb[2].mxu0 }
 0x2e8   :  { %v357_v38 = vadd.f32 %v382_v36, %v356_v37  ;;  %v431_v39 = vpop.f32.mrb[3].mxu0 }
 0x2ea   :  { %360 = vst [vmem:[#allocation12] sm:$0xff] %v357_v38 }
 0x2eb   :  { %582 = shalt.err (!%p579_p2)
}
 0x2ec   :  { %s583_s13 = scalar_lea.hbm %s770_s9, 128 }
 0x2ed   :  { %p584_p3 = scmp.ne.s32.totalorder %s770_s9, %s583_s13  ;;  %p587_p4 = scmp.lt.u32.totalorder %s583_s13, %s770_s9 }
 0x2ef   :  { %p589_p5 = pnand %p587_p4, %p584_p3 }
 0x2f1   :  { %592 = shalt.err (!%p589_p5)
}
 0x2f2   :  { %370 = dma.vmem_to_hbm [thread:$0]  %s368_s30, 128, %s770_s9, [#allocation5]  }
 0x2f3   :  { %599 = dma.done.wait [#allocation5], 128  }
 0x2f4   :  { %600 = vsyncadd [#allocation5], 4294967168 }
 0x2f5   :  { %374 = vsyncpa [#allocation4], 1 }
 0x2f6   :  { %375 = vsyncpa [#allocation7], 1 }
 0x2f7   :  { %376 = vsyncpa [#allocation10], 1 }
 0x2f8   :  { %377 = vsyncpa [#allocation5], 1 }

</bundles_post_ra>
